<compile_context>
chip_gen: v6e
topology: v6e:2x2x1
jax: 0.10.0
libtpu: 0.0.40
codegen_flags: <defaults>
</compile_context>

<pallas_src>
import math

import jax
import jax.numpy as jnp
from jax.experimental import pallas as pl
from jax.experimental.pallas import tpu as pltpu

OUT_PAD = 8  # final projection padded to 8 cols (block last dim == full array dim)


def _round_up(a: int, b: int) -> int:
    return ((a + b - 1) // b) * b


def _gelu(x):
    # TODO(synk): torch.nn.GELU defaults to the exact erf form; Mosaic has no
    # guaranteed erf lowering, so we use the tanh approximation (tanh lands on
    # the EUP slot, effectively free next to the MXU).
    return jax.nn.gelu(x, approximate=True)


def _mlp_head_kernel(x_ref, *refs):
    """Fused MLP head. refs = (W0, b0, W1, b1, ..., W_out, b_out, out_ref).

    All W_l / b_l are whole-array VMEM-resident blocks (constant index_map);
    x_ref / out_ref are row tiles.  Activations stay as f32 values (compiler
    managed vregs/VMEM) -- no per-layer scratch, no intermediate HBM writeback.
    """
    out_ref = refs[-1]
    wb = refs[:-1]
    n_hidden = len(wb) // 2 - 1  # number of Linear->GELU pairs (== n_layers)

    h = x_ref[...]               # load once; cast only at the dot operand
    for l in range(n_hidden):    # static unroll: n_layers is a trace-time const
        w = wb[2 * l][...]
        b = wb[2 * l + 1][...]   # (1, hidden): jnp broadcasting handles the add
        h = jnp.dot(h.astype(w.dtype), w, preferred_element_type=jnp.float32) + b
        h = _gelu(h)             # f32 activations

    w_out = wb[-2][...]          # (hidden, 8): zero-padded columns
    b_out = wb[-1][...]          # (1, 8): zero-padded
    y = jnp.dot(h.astype(w_out.dtype), w_out,
                preferred_element_type=jnp.float32) + b_out
    out_ref[...] = y.astype(out_ref.dtype)


def init_position_offset_head_params(key, in_dim, hidden_dim, n_layers,
                                     predict_box=False, dtype=jnp.float32):
    """PyTorch nn.Linear-style init; weights stored as (in_features, out_features)."""
    assert n_layers > 1, "Expected at least 1 hidden layer"
    out_dim = 6 if predict_box else 2
    dims = [in_dim] + [hidden_dim] * n_layers + [out_dim]
    params = []
    for d_in, d_out in zip(dims[:-1], dims[1:]):
        key, k_w, k_b = jax.random.split(key, 3)
        bound = 1.0 / math.sqrt(d_in)
        w = jax.random.uniform(k_w, (d_in, d_out), dtype, -bound, bound)
        b = jax.random.uniform(k_b, (d_out,), dtype, -bound, bound)
        params.append((w, b))
    return params


def prepare_kernel_params(params, compute_dtype=jnp.float32):
    """One-time packing: pad the final projection to OUT_PAD columns, reshape
    biases to (1, dim), and cast to the compute dtype (bf16 recommended on
    v6e/v7x).  All of this happens once at init, never per call."""
    ops = []
    n = len(params)
    for i, (w, b) in enumerate(params):
        if i == n - 1:
            d_out = w.shape[1]
            pad = _round_up(d_out, OUT_PAD) - d_out
            w = jnp.pad(w, ((0, 0), (0, pad)))
            b = jnp.pad(b, ((0, pad),))
        ops.append(jnp.asarray(w, compute_dtype))
        ops.append(jnp.asarray(b, compute_dtype).reshape(1, -1))
    return ops


def position_offset_head_forward(x, kernel_params, out_dim, *, tile_m=1024,
                                 vmem_cap_bytes=48 * 1024 * 1024,
                                 interpret=False):
    """x: (..., in_dim) -> (..., out_dim) via the fused Pallas MLP kernel.

    Pass x in bf16 (and bf16 kernel_params) on v6e/v7x to halve the streamed
    input bytes and use native bf16 MXU passes; accumulation is always f32.
    """
    *lead, in_dim = x.shape
    hidden_dim = kernel_params[0].shape[1]
    out_pad = kernel_params[-2].shape[1]
    n_linear = len(kernel_params) // 2

    n_rows = math.prod(lead)
    x2 = x.reshape(n_rows, in_dim)

    # Row tile: multiple of 8, as big as requested, but clamped so the grid has
    # >= 4 steps when possible (lets ("parallel",) split across v7x's 2 TCs).
    tile_m = max(8, min(_round_up(tile_m, 8), _round_up(pl.cdiv(n_rows, 4), 8)))
    grid = (pl.cdiv(n_rows, tile_m),)  # ragged last block is masked by Pallas

    in_specs = [pl.BlockSpec((tile_m, in_dim), lambda i: (i, 0))]
    for p in kernel_params:
        # Full-array block + constant index_map: weights are DMA'd once and
        # stay VMEM-resident across the row loop (no per-tile re-DMA).
        # pipeline_mode=pl.Buffered(1) would halve the resident copy, but the
        # footprint here is negligible so we keep the default buffering.
        in_specs.append(pl.BlockSpec(p.shape, lambda i: (0, 0)))
    out_specs = pl.BlockSpec((tile_m, out_pad), lambda i: (i, 0))

    # VMEM budget: double-buffered x/out tiles + resident weights + f32
    # activation working set with headroom, capped at 48 MiB (v7x-safe).
    x_itemsize = x2.dtype.itemsize
    w_bytes = sum(int(p.size) * p.dtype.itemsize for p in kernel_params)
    io_bytes = 2 * tile_m * in_dim * x_itemsize + 2 * tile_m * out_pad * x_itemsize
    act_bytes = 4 * tile_m * max(hidden_dim, in_dim, out_pad) * 4
    vmem_limit = min(int(vmem_cap_bytes),
                     max(16 * 1024 * 1024, 2 * (w_bytes + io_bytes + act_bytes)))

    dims = [in_dim] + [hidden_dim] * (n_linear - 1) + [out_pad]
    flops = 2 * n_rows * sum(a * b for a, b in zip(dims[:-1], dims[1:]))
    transcendentals = n_rows * hidden_dim * (n_linear - 1)
    bytes_accessed = n_rows * (in_dim + out_pad) * x_itemsize + w_bytes

    y8 = pl.pallas_call(
        _mlp_head_kernel,
        out_shape=jax.ShapeDtypeStruct((n_rows, out_pad), x.dtype),
        grid=grid,
        in_specs=in_specs,
        out_specs=out_specs,
        compiler_params=pltpu.CompilerParams(
            dimension_semantics=("parallel",),
            vmem_limit_bytes=int(vmem_limit),
        ),
        cost_estimate=pl.CostEstimate(
            flops=int(flops),
            transcendentals=int(transcendentals),
            bytes_accessed=int(bytes_accessed),
        ),
        interpret=interpret,
    )(x2, *kernel_params)

    # Tiny post-slice: reads 32 B/row (vs. 512 B/row in the previous revision).
    return y8[:, :out_dim].reshape(*lead, out_dim)


def position_offset_head_reference(x, params):
    """Pure-JAX reference (same math as the PyTorch module, tanh-GELU variant)."""
    h = x.astype(jnp.float32)
    for w, b in params[:-1]:
        h = _gelu(h @ w.astype(jnp.float32) + b.astype(jnp.float32))
    w, b = params[-1]
    return h @ w.astype(jnp.float32) + b.astype(jnp.float32)


if __name__ == "__main__":
    key = jax.random.PRNGKey(0)
    in_dim, hidden_dim, n_layers = 64, 128, 3
    predict_box = False               # -> out_dim = 2 (point offsets)
    out_dim = 6 if predict_box else 2
    batch, n_queries = 2, 96          # 192 rows -> tile_m clamps to 48 -> 4-step grid

    k_x, k_p = jax.random.split(key)
    x = jax.random.normal(k_x, (batch, n_queries, in_dim), jnp.float32)
    params = init_position_offset_head_params(
        k_p, in_dim, hidden_dim, n_layers, predict_box=predict_box)
    y_ref = position_offset_head_reference(x, params)

    # --- f32 path (default): exact check ---
    kp_f32 = prepare_kernel_params(params, jnp.float32)
    y = jax.block_until_ready(position_offset_head_forward(x, kp_f32, out_dim))
    assert y.shape == (batch, n_queries, out_dim), y.shape
    assert jnp.allclose(y, y_ref, atol=1e-4, rtol=1e-4), \
        float(jnp.max(jnp.abs(y - y_ref)))

    # --- bf16 path (recommended on v6e/v7x): bf16 weights + bf16-streamed x,
    #     f32 accumulation in-kernel; loose tolerance per the review ---
    kp_bf16 = prepare_kernel_params(params, jnp.bfloat16)
    x_bf16 = x.astype(jnp.bfloat16)   # in production upstream activations are bf16
    y_bf = jax.block_until_ready(
        position_offset_head_forward(x_bf16, kp_bf16, out_dim))
    assert y_bf.shape == (batch, n_queries, out_dim), y_bf.shape
    assert jnp.allclose(y_bf.astype(jnp.float32), y_ref, atol=1e-1, rtol=1e-1), \
        float(jnp.max(jnp.abs(y_bf.astype(jnp.float32) - y_ref)))

    print("KERNEL_OK")
</pallas_src>

<mosaic_0001>
module attributes {stable_mosaic.version = 11 : i64} {
  func.func @_mlp_head_kernel(%arg0: i32, %arg1: memref<48x64xf32, #tpu.memory_space<vmem>>, %arg2: memref<64x128xf32, #tpu.memory_space<vmem>>, %arg3: memref<1x128xf32, #tpu.memory_space<vmem>>, %arg4: memref<128x128xf32, #tpu.memory_space<vmem>>, %arg5: memref<1x128xf32, #tpu.memory_space<vmem>>, %arg6: memref<128x128xf32, #tpu.memory_space<vmem>>, %arg7: memref<1x128xf32, #tpu.memory_space<vmem>>, %arg8: memref<128x8xf32, #tpu.memory_space<vmem>>, %arg9: memref<1x8xf32, #tpu.memory_space<vmem>>, %arg10: memref<48x8xf32, #tpu.memory_space<vmem>>) attributes {dimension_semantics = [#tpu.dimension_semantics<parallel>], iteration_bounds = array<i64: 4>, scalar_prefetch = 0 : i64, scratch_operands = 0 : i64, tpu.core_type = #tpu.core_type<tc>, window_params = [{transform_indices = @transform_0, window_bounds = array<i64: 48, 64>}, {pipeline_mode = #tpu.pipeline_mode<synchronous>, transform_indices = @transform_1, window_bounds = array<i64: 64, 128>}, {pipeline_mode = #tpu.pipeline_mode<synchronous>, transform_indices = @transform_2, window_bounds = array<i64: 1, 128>}, {pipeline_mode = #tpu.pipeline_mode<synchronous>, transform_indices = @transform_3, window_bounds = array<i64: 128, 128>}, {pipeline_mode = #tpu.pipeline_mode<synchronous>, transform_indices = @transform_4, window_bounds = array<i64: 1, 128>}, {pipeline_mode = #tpu.pipeline_mode<synchronous>, transform_indices = @transform_5, window_bounds = array<i64: 128, 128>}, {pipeline_mode = #tpu.pipeline_mode<synchronous>, transform_indices = @transform_6, window_bounds = array<i64: 1, 128>}, {pipeline_mode = #tpu.pipeline_mode<synchronous>, transform_indices = @transform_7, window_bounds = array<i64: 128, 8>}, {pipeline_mode = #tpu.pipeline_mode<synchronous>, transform_indices = @transform_8, window_bounds = array<i64: 1, 8>}, {transform_indices = @transform_9, window_bounds = array<i64: 48, 8>}]} {
    %c0 = arith.constant 0 : index
    %c0_0 = arith.constant 0 : index
    %0 = vector.load %arg1[%c0, %c0_0] : memref<48x64xf32, #tpu.memory_space<vmem>>, vector<48x64xf32>
    %c0_1 = arith.constant 0 : index
    %c0_2 = arith.constant 0 : index
    %1 = vector.load %arg2[%c0_1, %c0_2] : memref<64x128xf32, #tpu.memory_space<vmem>>, vector<64x128xf32>
    %c0_3 = arith.constant 0 : index
    %c0_4 = arith.constant 0 : index
    %2 = vector.load %arg3[%c0_3, %c0_4] : memref<1x128xf32, #tpu.memory_space<vmem>>, vector<1x128xf32>
    %cst = arith.constant dense<0.000000e+00> : vector<48x128xf32>
    %3 = tpu.matmul %0, %1, %cst {dimension_numbers = #tpu.dot_dimension_numbers<[1], [0], [0], [1], [0, 0, 1, 1], [], []>} : vector<48x64xf32>, vector<64x128xf32>, vector<48x128xf32> -> vector<48x128xf32>
    %4 = vector.broadcast %2 : vector<1x128xf32> to vector<48x128xf32>
    %5 = arith.addf %3, %4 : vector<48x128xf32>
    %6 = arith.mulf %5, %5 : vector<48x128xf32>
    %7 = arith.mulf %5, %6 : vector<48x128xf32>
    %cst_5 = arith.constant 4.471500e-02 : f32
    %8 = vector.broadcast %cst_5 : f32 to vector<48x128xf32>
    %9 = arith.mulf %8, %7 : vector<48x128xf32>
    %10 = arith.addf %5, %9 : vector<48x128xf32>
    %cst_6 = arith.constant 0.797884583 : f32
    %11 = vector.broadcast %cst_6 : f32 to vector<48x128xf32>
    %12 = arith.mulf %11, %10 : vector<48x128xf32>
    %13 = math.tanh %12 : vector<48x128xf32>
    %cst_7 = arith.constant 1.000000e+00 : f32
    %14 = vector.broadcast %cst_7 : f32 to vector<48x128xf32>
    %15 = arith.addf %14, %13 : vector<48x128xf32>
    %cst_8 = arith.constant 5.000000e-01 : f32
    %16 = vector.broadcast %cst_8 : f32 to vector<48x128xf32>
    %17 = arith.mulf %16, %15 : vector<48x128xf32>
    %18 = arith.mulf %5, %17 : vector<48x128xf32>
    %c0_9 = arith.constant 0 : index
    %c0_10 = arith.constant 0 : index
    %19 = vector.load %arg4[%c0_9, %c0_10] : memref<128x128xf32, #tpu.memory_space<vmem>>, vector<128x128xf32>
    %c0_11 = arith.constant 0 : index
    %c0_12 = arith.constant 0 : index
    %20 = vector.load %arg5[%c0_11, %c0_12] : memref<1x128xf32, #tpu.memory_space<vmem>>, vector<1x128xf32>
    %cst_13 = arith.constant dense<0.000000e+00> : vector<48x128xf32>
    %21 = tpu.matmul %18, %19, %cst_13 {dimension_numbers = #tpu.dot_dimension_numbers<[1], [0], [0], [1], [0, 0, 1, 1], [], []>} : vector<48x128xf32>, vector<128x128xf32>, vector<48x128xf32> -> vector<48x128xf32>
    %22 = vector.broadcast %20 : vector<1x128xf32> to vector<48x128xf32>
    %23 = arith.addf %21, %22 : vector<48x128xf32>
    %24 = arith.mulf %23, %23 : vector<48x128xf32>
    %25 = arith.mulf %23, %24 : vector<48x128xf32>
    %cst_14 = arith.constant 4.471500e-02 : f32
    %26 = vector.broadcast %cst_14 : f32 to vector<48x128xf32>
    %27 = arith.mulf %26, %25 : vector<48x128xf32>
    %28 = arith.addf %23, %27 : vector<48x128xf32>
    %cst_15 = arith.constant 0.797884583 : f32
    %29 = vector.broadcast %cst_15 : f32 to vector<48x128xf32>
    %30 = arith.mulf %29, %28 : vector<48x128xf32>
    %31 = math.tanh %30 : vector<48x128xf32>
    %cst_16 = arith.constant 1.000000e+00 : f32
    %32 = vector.broadcast %cst_16 : f32 to vector<48x128xf32>
    %33 = arith.addf %32, %31 : vector<48x128xf32>
    %cst_17 = arith.constant 5.000000e-01 : f32
    %34 = vector.broadcast %cst_17 : f32 to vector<48x128xf32>
    %35 = arith.mulf %34, %33 : vector<48x128xf32>
    %36 = arith.mulf %23, %35 : vector<48x128xf32>
    %c0_18 = arith.constant 0 : index
    %c0_19 = arith.constant 0 : index
    %37 = vector.load %arg6[%c0_18, %c0_19] : memref<128x128xf32, #tpu.memory_space<vmem>>, vector<128x128xf32>
    %c0_20 = arith.constant 0 : index
    %c0_21 = arith.constant 0 : index
    %38 = vector.load %arg7[%c0_20, %c0_21] : memref<1x128xf32, #tpu.memory_space<vmem>>, vector<1x128xf32>
    %cst_22 = arith.constant dense<0.000000e+00> : vector<48x128xf32>
    %39 = tpu.matmul %36, %37, %cst_22 {dimension_numbers = #tpu.dot_dimension_numbers<[1], [0], [0], [1], [0, 0, 1, 1], [], []>} : vector<48x128xf32>, vector<128x128xf32>, vector<48x128xf32> -> vector<48x128xf32>
    %40 = vector.broadcast %38 : vector<1x128xf32> to vector<48x128xf32>
    %41 = arith.addf %39, %40 : vector<48x128xf32>
    %42 = arith.mulf %41, %41 : vector<48x128xf32>
    %43 = arith.mulf %41, %42 : vector<48x128xf32>
    %cst_23 = arith.constant 4.471500e-02 : f32
    %44 = vector.broadcast %cst_23 : f32 to vector<48x128xf32>
    %45 = arith.mulf %44, %43 : vector<48x128xf32>
    %46 = arith.addf %41, %45 : vector<48x128xf32>
    %cst_24 = arith.constant 0.797884583 : f32
    %47 = vector.broadcast %cst_24 : f32 to vector<48x128xf32>
    %48 = arith.mulf %47, %46 : vector<48x128xf32>
    %49 = math.tanh %48 : vector<48x128xf32>
    %cst_25 = arith.constant 1.000000e+00 : f32
    %50 = vector.broadcast %cst_25 : f32 to vector<48x128xf32>
    %51 = arith.addf %50, %49 : vector<48x128xf32>
    %cst_26 = arith.constant 5.000000e-01 : f32
    %52 = vector.broadcast %cst_26 : f32 to vector<48x128xf32>
    %53 = arith.mulf %52, %51 : vector<48x128xf32>
    %54 = arith.mulf %41, %53 : vector<48x128xf32>
    %c0_27 = arith.constant 0 : index
    %c0_28 = arith.constant 0 : index
    %55 = vector.load %arg8[%c0_27, %c0_28] : memref<128x8xf32, #tpu.memory_space<vmem>>, vector<128x8xf32>
    %c0_29 = arith.constant 0 : index
    %c0_30 = arith.constant 0 : index
    %56 = vector.load %arg9[%c0_29, %c0_30] : memref<1x8xf32, #tpu.memory_space<vmem>>, vector<1x8xf32>
    %cst_31 = arith.constant dense<0.000000e+00> : vector<48x8xf32>
    %57 = tpu.matmul %54, %55, %cst_31 {dimension_numbers = #tpu.dot_dimension_numbers<[1], [0], [0], [1], [0, 0, 1, 1], [], []>} : vector<48x128xf32>, vector<128x8xf32>, vector<48x8xf32> -> vector<48x8xf32>
    %58 = vector.broadcast %56 : vector<1x8xf32> to vector<48x8xf32>
    %59 = arith.addf %57, %58 : vector<48x8xf32>
    %c0_32 = arith.constant 0 : index
    %c0_33 = arith.constant 0 : index
    %60 = vector.load %arg10[%c0_32, %c0_33] : memref<48x8xf32, #tpu.memory_space<vmem>>, vector<48x8xf32>
    tpu.vector_store %arg10[%c0_32, %c0_33], %59 {strides = array<i32>} : memref<48x8xf32, #tpu.memory_space<vmem>>, vector<48x8xf32>,
    return
  }
  func.func @transform_0(%arg0: i32) -> (i32, i32) {
    %c0_i32 = arith.constant 0 : i32
    %c0_i32_0 = arith.constant 0 : i32
    return %arg0, %c0_i32 : i32, i32
  }
  func.func @transform_1(%arg0: i32) -> (i32, i32) {
    %c0_i32 = arith.constant 0 : i32
    %c0_i32_0 = arith.constant 0 : i32
    %c0_i32_1 = arith.constant 0 : i32
    return %c0_i32, %c0_i32_0 : i32, i32
  }
  func.func @transform_2(%arg0: i32) -> (i32, i32) {
    %c0_i32 = arith.constant 0 : i32
    %c0_i32_0 = arith.constant 0 : i32
    %c0_i32_1 = arith.constant 0 : i32
    return %c0_i32, %c0_i32_0 : i32, i32
  }
  func.func @transform_3(%arg0: i32) -> (i32, i32) {
    %c0_i32 = arith.constant 0 : i32
    %c0_i32_0 = arith.constant 0 : i32
    %c0_i32_1 = arith.constant 0 : i32
    return %c0_i32, %c0_i32_0 : i32, i32
  }
  func.func @transform_4(%arg0: i32) -> (i32, i32) {
    %c0_i32 = arith.constant 0 : i32
    %c0_i32_0 = arith.constant 0 : i32
    %c0_i32_1 = arith.constant 0 : i32
    return %c0_i32, %c0_i32_0 : i32, i32
  }
  func.func @transform_5(%arg0: i32) -> (i32, i32) {
    %c0_i32 = arith.constant 0 : i32
    %c0_i32_0 = arith.constant 0 : i32
    %c0_i32_1 = arith.constant 0 : i32
    return %c0_i32, %c0_i32_0 : i32, i32
  }
  func.func @transform_6(%arg0: i32) -> (i32, i32) {
    %c0_i32 = arith.constant 0 : i32
    %c0_i32_0 = arith.constant 0 : i32
    %c0_i32_1 = arith.constant 0 : i32
    return %c0_i32, %c0_i32_0 : i32, i32
  }
  func.func @transform_7(%arg0: i32) -> (i32, i32) {
    %c0_i32 = arith.constant 0 : i32
    %c0_i32_0 = arith.constant 0 : i32
    %c0_i32_1 = arith.constant 0 : i32
    return %c0_i32, %c0_i32_0 : i32, i32
  }
  func.func @transform_8(%arg0: i32) -> (i32, i32) {
    %c0_i32 = arith.constant 0 : i32
    %c0_i32_0 = arith.constant 0 : i32
    %c0_i32_1 = arith.constant 0 : i32
    return %c0_i32, %c0_i32_0 : i32, i32
  }
  func.func @transform_9(%arg0: i32) -> (i32, i32) {
    %c0_i32 = arith.constant 0 : i32
    %c0_i32_0 = arith.constant 0 : i32
    return %arg0, %c0_i32 : i32, i32
  }
}

</mosaic_0001>

<bundles_post_ra>
// kernel: tpu_custom_call.1
= control target key start
LH: loop header
LB: loop body
LE: loop exit
PB: predicated region body
PF: predicated region fallthrough
CT: control target
= control target key end

     0   :  { %s1399_s30 = smov 0   ;;  %s1615_s0 = inlined_call_operand.vmem [shape: f32[192,64], index: 0, kind: input, shape index: {}]   ;;  %s1616_s1 = inlined_call_operand.vmem [shape: f32[64,128], index: 1, kind: input, shape index: {}]   ;;  %s1617_s2 = inlined_call_operand.vmem [shape: f32[1,128], index: 2, kind: input, shape index: {}]   ;;  %s1618_s3 = inlined_call_operand.vmem [shape: f32[128,128], index: 3, kind: input, shape index: {}]   ;;  %s1619_s4 = inlined_call_operand.vmem [shape: f32[1,128], index: 4, kind: input, shape index: {}]   ;;  %s1620_s5 = inlined_call_operand.vmem [shape: f32[128,128], index: 5, kind: input, shape index: {}]   ;;  %s1621_s6 = inlined_call_operand.vmem [shape: f32[1,128], index: 6, kind: input, shape index: {}]   ;;  %s1622_s7 = inlined_call_operand.vmem [shape: f32[128,8], index: 7, kind: input, shape index: {}]   ;;  %s1623_s8 = inlined_call_operand.vmem [shape: f32[1,8], index: 8, kind: input, shape index: {}]   ;;  %s1624_s9 = inlined_call_operand.vmem [shape: f32[192,8], index: 9, kind: output, shape index: {}]  }
   0x1 LB: > { %s1050_s10 = sadd.s32 4294967295, %s1347_s30   ;;  %p1054_p0 = scmp.ge.s32.totalorder %s1347_s30, 1  ;;  %s1347_s30 = sphi %s1399_s30, %s19_s30  }
   0x2   : > { %p288_p1 = scmp.lt.s32.totalorder %s1347_s30, 5 }
   0x4   : > { %p289_p2 = pnand %p1054_p0, %p288_p1 }
   0x5   : > { %s324_s15 = smul.u32 (!%p289_p2), 6, %s1050_s10 }
   0x6   : > { %292 = sbr.rel (%p289_p2) target bundleno = 920 (0x398), region = 56 }
   0x7   : > { %p325_p3 = scmp.lt.s32.totalorder (!%p289_p2), %s324_s15, 23 }
   0xb   : > { %v349_v0 = vld [vmem:[%s1616_s1 + $0x38] sm:$0xff]  ;;  %v348_v1 = vld [vmem:[%s1616_s1 + $0x30] sm:$0xff]  ;;  %v347_v2 = vld [vmem:[%s1616_s1 + $0x28] sm:$0xff]  ;;  %s1626_s15 = smov (!%p325_p3, %s324_s15), 23  ;;  %vm357_vm0 = vcmask 523264   ;;  %vm987_vm1 = vcmask 64512  }
   0xc   : > { %1149 = vmatprep.subr.mxu0 %v349_v0  ;;  %v346_v3 = vld [vmem:[%s1616_s1 + $0x20] sm:$0xff]  ;;  %v345_v4 = vld [vmem:[%s1616_s1 + $0x18] sm:$0xff]  ;;  %s1055_s22 = sshll.u32 %s1626_s15, 3  ;;  %v344_v5 = vld [vmem:[%s1616_s1 + $0x10] sm:$0xff] }
   0xd   : > { %1150 = vmatpush3.msra.mxu0 %v349_v0  ;;  %s328_s25 = scalar_lea.vmem %s1615_s0, %s1055_s22  ;;  %v343_v7 = vld [vmem:[%s1616_s1 + $0x8] sm:$0xff]  ;;  %v342_v8 = vld [vmem:[%s1616_s1] sm:$0xff]  ;;  %v540_v14 = vld [vmem:[%s1618_s3 + $0x78] sm:$0xff]  ;;  %s334_s10 = scalar_lea.vmem %s1624_s9, %s1055_s22 }
   0xe   : > { %1151 = vmatprep.subr.mxu0 %v348_v1  ;;  %v336_v6 = vld [vmem:[%s328_s25] sm:$0xff]  ;;  %v337_v9 = vld [vmem:[%s328_s25 + $0x8] sm:$0xff]  ;;  %v338_v10 = vld [vmem:[%s328_s25 + $0x10] sm:$0xff]  ;;  %1174 = vmatprep.subr.mxu1 %v540_v14 }
   0xf   : > { %1152 = vmatpush3.msra.mxu0 %v348_v1  ;;  %1165 = vmatprep.mubr.msk.f32.mxu0 %vm357_vm0, %v336_v6  ;;  %v339_v11 = vld [vmem:[%s328_s25 + $0x18] sm:$0xff]  ;;  %v340_v12 = vld [vmem:[%s328_s25 + $0x20] sm:$0xff]  ;;  %v341_v13 = vld [vmem:[%s328_s25 + $0x28] sm:$0xff] }
  0x10   : > { %1153 = vmatprep.subr.mxu0 %v347_v2  ;;  %1175 = vmatpush3.msra.mxu1 %v540_v14  ;;  %v539_v15 = vld [vmem:[%s1618_s3 + $0x70] sm:$0xff]  ;;  %v538_v16 = vld [vmem:[%s1618_s3 + $0x68] sm:$0xff]  ;;  %v537_v17 = vld [vmem:[%s1618_s3 + $0x60] sm:$0xff] }
  0x11   : > { %1154 = vmatpush3.msra.mxu0 %v347_v2  ;;  %1176 = vmatprep.subr.mxu1 %v539_v15  ;;  %v536_v18 = vld [vmem:[%s1618_s3 + $0x58] sm:$0xff]  ;;  %v535_v19 = vld [vmem:[%s1618_s3 + $0x50] sm:$0xff]  ;;  %v534_v20 = vld [vmem:[%s1618_s3 + $0x48] sm:$0xff] }
  0x12   : > { %1155 = vmatprep.subr.mxu0 %v346_v3  ;;  %1177 = vmatpush3.msra.mxu1 %v539_v15  ;;  %v533_v21 = vld [vmem:[%s1618_s3 + $0x40] sm:$0xff]  ;;  %v532_v22 = vld [vmem:[%s1618_s3 + $0x38] sm:$0xff]  ;;  %v531_v23 = vld [vmem:[%s1618_s3 + $0x30] sm:$0xff] }
  0x13   : > { %1156 = vmatpush3.msra.mxu0 %v346_v3  ;;  %1178 = vmatprep.subr.mxu1 %v538_v16  ;;  %v530_v24 = vld [vmem:[%s1618_s3 + $0x28] sm:$0xff]  ;;  %v529_v25 = vld [vmem:[%s1618_s3 + $0x20] sm:$0xff]  ;;  %v528_v26 = vld [vmem:[%s1618_s3 + $0x18] sm:$0xff] }
  0x14   : > { %1157 = vmatprep.subr.mxu0 %v345_v4  ;;  %1179 = vmatpush3.msra.mxu1 %v538_v16  ;;  %v527_v27 = vld [vmem:[%s1618_s3 + $0x10] sm:$0xff]  ;;  %v526_v28 = vld [vmem:[%s1618_s3 + $0x8] sm:$0xff]  ;;  %v525_v29 = vld [vmem:[%s1618_s3] sm:$0xff] }
  0x15   : > { %1158 = vmatpush3.msra.mxu0 %v345_v4  ;;  %1180 = vmatprep.subr.mxu1 %v537_v17  ;;  %v1057_v30 = vld [vmem:[%s1617_s2] ss:$0 sm:$0xff] }
  0x16   : > { %1159 = vmatprep.subr.mxu0 %v344_v5  ;;  %1181 = vmatpush3.msra.mxu1 %v537_v17 }
  0x17   : > { %1160 = vmatpush3.msra.mxu0 %v344_v5  ;;  %1182 = vmatprep.subr.mxu1 %v536_v18 }
  0x18   : > { %1161 = vmatprep.subr.mxu0 %v343_v7  ;;  %1183 = vmatpush3.msra.mxu1 %v536_v18 }
  0x19   : > { %1162 = vmatpush3.msra.mxu0 %v343_v7  ;;  %1184 = vmatprep.subr.mxu1 %v535_v19 }
  0x1a   : > { %1163 = vmatprep.subr.mxu0 %v342_v8  ;;  %1185 = vmatpush3.msra.mxu1 %v535_v19 }
  0x1b   : > { %1164 = vmatpush3.msra.mxu0 %v342_v8  ;;  %1186 = vmatprep.subr.mxu1 %v534_v20 }
  0x1c   : > { %1166 = vmatmul.mubr.msk.f32.vlgmr.msra.gmra.mxu0 %vm357_vm0, %v337_v9  ;;  %1187 = vmatpush3.msra.mxu1 %v534_v20 }
  0x1d   : > { %1168 = vmatprep.mubr.msk.f32.mxu0 %vm357_vm0, %v338_v10  ;;  %1188 = vmatprep.subr.mxu1 %v533_v21 }
  0x1e   : > { %1189 = vmatpush3.msra.mxu1 %v533_v21 }
  0x1f   : > { %1190 = vmatprep.subr.mxu1 %v532_v22 }
  0x20   : > { %1169 = vmatmul.mubr.msk.f32.gmra.mxu0 %vm357_vm0, %v339_v11  ;;  %1191 = vmatpush3.msra.mxu1 %v532_v22 }
  0x21   : > { %1171 = vmatprep.mubr.msk.f32.mxu0 %vm357_vm0, %v340_v12  ;;  %1192 = vmatprep.subr.mxu1 %v531_v23 }
  0x22   : > { %1193 = vmatpush3.msra.mxu1 %v531_v23 }
  0x23   : > { %1194 = vmatprep.subr.mxu1 %v530_v24 }
  0x24   : > { %1172 = vmatmul.mubr.msk.f32.gmra.mxu0 %vm357_vm0, %v341_v13  ;;  %1195 = vmatpush3.msra.mxu1 %v530_v24 }
  0x25   : > { %1196 = vmatprep.subr.mxu1 %v529_v25 }
  0x26   : > { %1197 = vmatpush3.msra.mxu1 %v529_v25 }
  0x27   : > { %1198 = vmatprep.subr.mxu1 %v528_v26 }
  0x28   : > { %1199 = vmatpush3.msra.mxu1 %v528_v26 }
  0x29   : > { %1200 = vmatprep.subr.mxu1 %v527_v27 }
  0x2a   : > { %1201 = vmatpush3.msra.mxu1 %v527_v27 }
  0x2b   : > { %1202 = vmatprep.subr.mxu1 %v526_v28 }
  0x2c   : > { %1203 = vmatpush3.msra.mxu1 %v526_v28 }
  0x2d   : > { %1204 = vmatprep.subr.mxu1 %v525_v29 }
  0x2e   : > { %1205 = vmatpush3.msra.mxu1 %v525_v29 }
  0xdc   : > { %v1167_v31 = vpop.f32.mrf.mxu0 }
  0xdd   : > { %v448_v32 = vadd.f32 %v1167_v31, %v1057_v30 }
  0xde   : > { %v442_v33 = vpop.f32.mrf.mxu0 }
  0xdf   : > { %v472_v34 = vmul.f32 %v448_v32, %v448_v32  ;;  %v443_v35 = vadd.f32 %v1057_v30, %v442_v33 }
  0xe0   : > { %v1170_v36 = vpop.f32.mrf.mxu0 }
  0xe1   : > { %v478_v37 = vmul.f32 %v472_v34, %v448_v32  ;;  %v471_v38 = vmul.f32 %v443_v35, %v443_v35  ;;  %v458_v39 = vadd.f32 %v1170_v36, %v1057_v30  ;;  %v711_v34 = vld [vmem:[%s1620_s5 + $0x70] sm:$0xff]  ;;  %v709_v36 = vld [vmem:[%s1620_s5 + $0x60] sm:$0xff] }
  0xe2   : > { %v452_v40 = vpop.f32.mrf.mxu0 }
  0xe3   : > { %v484_v41 = vmul.f32 0.044715, %v478_v37  ;;  %v477_v42 = vmul.f32 %v471_v38, %v443_v35  ;;  %v474_v43 = vmul.f32 %v458_v39, %v458_v39  ;;  %v453_v44 = vadd.f32 %v1057_v30, %v452_v40  ;;  %v708_v37 = vld [vmem:[%s1620_s5 + $0x58] sm:$0xff]  ;;  %v707_v38 = vld [vmem:[%s1620_s5 + $0x50] sm:$0xff]  ;;  %v705_v40 = vld [vmem:[%s1620_s5 + $0x40] sm:$0xff] }
  0xe4   : > { %v1173_v45 = vpop.f32.mrf.mxu0 }
  0xe5   : > { %v490_v46 = vadd.f32 %v484_v41, %v448_v32  ;;  %v480_v47 = vmul.f32 %v474_v43, %v458_v39  ;;  %v473_v48 = vmul.f32 %v453_v44, %v453_v44  ;;  %v468_v49 = vadd.f32 %v1173_v45, %v1057_v30  ;;  %v704_v41 = vld [vmem:[%s1620_s5 + $0x38] sm:$0xff]  ;;  %v702_v43 = vld [vmem:[%s1620_s5 + $0x28] sm:$0xff] }
  0xe6   : > { %v462_v50 = vpop.f32.mrf.mxu0  ;;  %v483_v51 = vmul.f32 0.044715, %v477_v42  ;;  %v703_v42 = vld [vmem:[%s1620_s5 + $0x30] sm:$0xff]  ;;  %v700_v45 = vld [vmem:[%s1620_s5 + $0x18] sm:$0xff] }
  0xe7   : > { %v496_v52 = vmul.f32 0.7978846, %v490_v46  ;;  %v486_v53 = vmul.f32 0.044715, %v480_v47  ;;  %v479_v54 = vmul.f32 %v473_v48, %v453_v44  ;;  %v476_v55 = vmul.f32 %v468_v49, %v468_v49  ;;  %v699_v46 = vld [vmem:[%s1620_s5 + $0x10] sm:$0xff]  ;;  %v698_v47 = vld [vmem:[%s1620_s5 + $0x8] sm:$0xff] }
  0xe8   : > { %v463_v56 = vadd.f32 %v1057_v30, %v462_v50  ;;  %v489_v57 = vadd.f32 %v483_v51, %v443_v35  ;;  %v697_v48 = vld [vmem:[%s1620_s5] sm:$0xff] }
  0xe9   : > { %1305 = vtanh.f32 %v496_v52  ;;  %v492_v58 = vadd.f32 %v486_v53, %v458_v39  ;;  %v485_v59 = vmul.f32 0.044715, %v479_v54  ;;  %v482_v60 = vmul.f32 %v476_v55, %v468_v49 }
  0xea   : > { %v475_v61 = vmul.f32 %v463_v56, %v463_v56  ;;  %v495_v62 = vmul.f32 0.7978846, %v489_v57 }
  0xeb   : > { %v498_v63 = vmul.f32 0.7978846, %v492_v58  ;;  %v491_v0 = vadd.f32 %v485_v59, %v453_v44  ;;  %v488_v1 = vmul.f32 0.044715, %v482_v60 }
  0xec   : > { %v481_v2 = vmul.f32 %v475_v61, %v463_v56  ;;  %1307 = vtanh.f32 %v495_v62 }
  0xed   : > { %1309 = vtanh.f32 %v498_v63  ;;  %v497_v3 = vmul.f32 0.7978846, %v491_v0  ;;  %v494_v4 = vadd.f32 %v488_v1, %v468_v49 }
  0xee   : > { %v487_v5 = vmul.f32 0.044715, %v481_v2 }
  0xef   : > { %1311 = vtanh.f32 %v497_v3  ;;  %v500_v6 = vmul.f32 0.7978846, %v494_v4 }
  0xf0   : > { %v493_v7 = vadd.f32 %v487_v5, %v463_v56 }
  0xf1   : > { %1313 = vtanh.f32 %v500_v6 }
  0xf2   : > { %v499_v8 = vmul.f32 0.7978846, %v493_v7 }
  0xf4   : > { %1315 = vtanh.f32 %v499_v8 }
  0xf6   : > { %v1306_v9 = vpop.eup %1305 }
  0xf7   : > { %v508_v10 = vadd.f32 1.0, %v1306_v9 }
  0xf9   : > { %v1308_v11 = vpop.eup %1307  ;;  %v514_v14 = vmul.f32 0.5, %v508_v10 }
  0xfa   : > { %v1310_v12 = vpop.eup %1309  ;;  %v507_v13 = vadd.f32 1.0, %v1308_v11 }
  0xfb   : > { %v510_v15 = vadd.f32 1.0, %v1310_v12  ;;  %v520_v21 = vmul.f32 %v514_v14, %v448_v32  ;;  %v712_v32 = vld [vmem:[%s1620_s5 + $0x78] sm:$0xff] }
  0xfc   : > { %v1312_v16 = vpop.eup %1311  ;;  %v513_v17 = vmul.f32 0.5, %v507_v13  ;;  %1215 = vmatprep.subr.mxu0 %v712_v32 }
  0xfd   : > { %v509_v18 = vadd.f32 1.0, %v1312_v16  ;;  %v516_v23 = vmul.f32 0.5, %v510_v15  ;;  %1216 = vmatpush3.msra.mxu0 %v712_v32 }
  0xfe   : > { %v1314_v19 = vpop.eup %1313  ;;  %v519_v20 = vmul.f32 %v513_v17, %v443_v35  ;;  %1217 = vmatprep.subr.mxu0 %v711_v34  ;;  %v710_v35 = vld [vmem:[%s1620_s5 + $0x68] sm:$0xff] }
  0xff   : > { %v515_v22 = vmul.f32 0.5, %v509_v18  ;;  %v512_v24 = vadd.f32 1.0, %v1314_v19  ;;  %v522_v28 = vmul.f32 %v516_v23, %v458_v39  ;;  %1218 = vmatpush3.msra.mxu0 %v711_v34  ;;  %v706_v39 = vld [vmem:[%s1620_s5 + $0x48] sm:$0xff] }
 0x100   : > { %1206 = vmatprep.mubr.f32.mxu1 %v519_v20  ;;  %1219 = vmatprep.subr.mxu0 %v710_v35 }
 0x101   : > { %v1316_v25 = vpop.eup %1315  ;;  %1207 = vmatmul.mubr.f32.vlgmr.msra.gmra.mxu1 %v520_v21  ;;  %v521_v26 = vmul.f32 %v515_v22, %v453_v44  ;;  %v518_v29 = vmul.f32 0.5, %v512_v24  ;;  %1220 = vmatpush3.msra.mxu0 %v710_v35  ;;  %v701_v44 = vld [vmem:[%s1620_s5 + $0x20] sm:$0xff] }
 0x102   : > { %v511_v27 = vadd.f32 1.0, %v1316_v25  ;;  %1221 = vmatprep.subr.mxu0 %v709_v36 }
 0x103   : > { %1209 = vmatprep.mubr.f32.mxu1 %v521_v26  ;;  %v524_v33 = vmul.f32 %v518_v29, %v468_v49  ;;  %1222 = vmatpush3.msra.mxu0 %v709_v36  ;;  %v1064_v49 = vld [vmem:[%s1619_s4] ss:$0 sm:$0xff] }
 0x104   : > { %v517_v30 = vmul.f32 0.5, %v511_v27  ;;  %1223 = vmatprep.subr.mxu0 %v708_v37 }
 0x105   : > { %1210 = vmatmul.mubr.f32.gmra.mxu1 %v522_v28  ;;  %1224 = vmatpush3.msra.mxu0 %v708_v37 }
 0x106   : > { %v523_v31 = vmul.f32 %v517_v30, %v463_v56  ;;  %1225 = vmatprep.subr.mxu0 %v707_v38 }
 0x107   : > { %1226 = vmatpush3.msra.mxu0 %v707_v38 }
 0x108   : > { %1212 = vmatprep.mubr.f32.mxu1 %v523_v31  ;;  %1227 = vmatprep.subr.mxu0 %v706_v39 }
 0x109   : > { %1213 = vmatmul.mubr.f32.gmra.mxu1 %v524_v33  ;;  %1228 = vmatpush3.msra.mxu0 %v706_v39 }
 0x10a   : > { %1229 = vmatprep.subr.mxu0 %v705_v40 }
 0x10b   : > { %1230 = vmatpush3.msra.mxu0 %v705_v40 }
 0x10c   : > { %1231 = vmatprep.subr.mxu0 %v704_v41 }
 0x10d   : > { %1232 = vmatpush3.msra.mxu0 %v704_v41 }
 0x10e   : > { %1233 = vmatprep.subr.mxu0 %v703_v42 }
 0x10f   : > { %1234 = vmatpush3.msra.mxu0 %v703_v42 }
 0x110   : > { %1235 = vmatprep.subr.mxu0 %v702_v43 }
 0x111   : > { %1236 = vmatpush3.msra.mxu0 %v702_v43 }
 0x112   : > { %1237 = vmatprep.subr.mxu0 %v701_v44 }
 0x113   : > { %1238 = vmatpush3.msra.mxu0 %v701_v44 }
 0x114   : > { %1239 = vmatprep.subr.mxu0 %v700_v45 }
 0x115   : > { %1240 = vmatpush3.msra.mxu0 %v700_v45 }
 0x116   : > { %1241 = vmatprep.subr.mxu0 %v699_v46 }
 0x117   : > { %1242 = vmatpush3.msra.mxu0 %v699_v46 }
 0x118   : > { %1243 = vmatprep.subr.mxu0 %v698_v47 }
 0x119   : > { %1244 = vmatpush3.msra.mxu0 %v698_v47 }
 0x11a   : > { %1245 = vmatprep.subr.mxu0 %v697_v48 }
 0x11b   : > { %1246 = vmatpush3.msra.mxu0 %v697_v48 }
 0x1c1   : > { %v1208_v50 = vpop.f32.mrf.mxu1 }
 0x1c2   : > { %v620_v51 = vadd.f32 %v1208_v50, %v1064_v49 }
 0x1c3   : > { %v614_v52 = vpop.f32.mrf.mxu1 }
 0x1c4   : > { %v644_v53 = vmul.f32 %v620_v51, %v620_v51  ;;  %v615_v54 = vadd.f32 %v1064_v49, %v614_v52 }
 0x1c5   : > { %v1211_v55 = vpop.f32.mrf.mxu1 }
 0x1c6   : > { %v650_v56 = vmul.f32 %v644_v53, %v620_v51  ;;  %v643_v57 = vmul.f32 %v615_v54, %v615_v54  ;;  %v630_v58 = vadd.f32 %v1211_v55, %v1064_v49  ;;  %v883_v53 = vld [vmem:[%s1622_s7 + $0x70] sm:$0xff]  ;;  %v881_v55 = vld [vmem:[%s1622_s7 + $0x60] sm:$0xff] }
 0x1c7   : > { %v624_v59 = vpop.f32.mrf.mxu1 }
 0x1c8   : > { %v656_v60 = vmul.f32 0.044715, %v650_v56  ;;  %v649_v61 = vmul.f32 %v643_v57, %v615_v54  ;;  %v646_v62 = vmul.f32 %v630_v58, %v630_v58  ;;  %v625_v63 = vadd.f32 %v1064_v49, %v624_v59  ;;  %v880_v56 = vld [vmem:[%s1622_s7 + $0x58] sm:$0xff]  ;;  %v879_v57 = vld [vmem:[%s1622_s7 + $0x50] sm:$0xff]  ;;  %v877_v59 = vld [vmem:[%s1622_s7 + $0x40] sm:$0xff] }
 0x1c9   : > { %v1214_v0 = vpop.f32.mrf.mxu1 }
 0x1ca   : > { %v662_v1 = vadd.f32 %v656_v60, %v620_v51  ;;  %v655_v2 = vmul.f32 0.044715, %v649_v61  ;;  %v652_v3 = vmul.f32 %v646_v62, %v630_v58  ;;  %v645_v4 = vmul.f32 %v625_v63, %v625_v63  ;;  %v876_v60 = vld [vmem:[%s1622_s7 + $0x38] sm:$0xff]  ;;  %v875_v61 = vld [vmem:[%s1622_s7 + $0x30] sm:$0xff]  ;;  %v874_v62 = vld [vmem:[%s1622_s7 + $0x28] sm:$0xff] }
 0x1cb   : > { %v640_v5 = vadd.f32 %v1214_v0, %v1064_v49  ;;  %v634_v6 = vpop.f32.mrf.mxu1  ;;  %v872_v0 = vld [vmem:[%s1622_s7 + $0x18] sm:$0xff] }
 0x1cc   : > { %v668_v7 = vmul.f32 0.7978846, %v662_v1  ;;  %v661_v8 = vadd.f32 %v655_v2, %v615_v54  ;;  %v658_v9 = vmul.f32 0.044715, %v652_v3  ;;  %v651_v10 = vmul.f32 %v645_v4, %v625_v63  ;;  %v871_v1 = vld [vmem:[%s1622_s7 + $0x10] sm:$0xff]  ;;  %v870_v2 = vld [vmem:[%s1622_s7 + $0x8] sm:$0xff] }
 0x1cd   : > { %v648_v11 = vmul.f32 %v640_v5, %v640_v5  ;;  %v635_v12 = vadd.f32 %v1064_v49, %v634_v6  ;;  %v869_v3 = vld [vmem:[%s1622_s7] sm:$0xff] }
 0x1ce   : > { %1317 = vtanh.f32 %v668_v7  ;;  %v667_v13 = vmul.f32 0.7978846, %v661_v8  ;;  %v664_v14 = vadd.f32 %v658_v9, %v630_v58  ;;  %v657_v15 = vmul.f32 0.044715, %v651_v10  ;;  %v1065_v4 = vld [vmem:[%s1621_s6] ss:$0 sm:$0xff] }
 0x1cf   : > { %v654_v16 = vmul.f32 %v648_v11, %v640_v5  ;;  %v647_v17 = vmul.f32 %v635_v12, %v635_v12 }
 0x1d0   : > { %1319 = vtanh.f32 %v667_v13  ;;  %v670_v18 = vmul.f32 0.7978846, %v664_v14  ;;  %v663_v19 = vadd.f32 %v657_v15, %v625_v63 }
 0x1d1   : > { %v660_v20 = vmul.f32 0.044715, %v654_v16  ;;  %v653_v21 = vmul.f32 %v647_v17, %v635_v12 }
 0x1d2   : > { %1321 = vtanh.f32 %v670_v18  ;;  %v669_v22 = vmul.f32 0.7978846, %v663_v19 }
 0x1d3   : > { %v666_v23 = vadd.f32 %v660_v20, %v640_v5  ;;  %v659_v24 = vmul.f32 0.044715, %v653_v21 }
 0x1d4   : > { %1323 = vtanh.f32 %v669_v22 }
 0x1d5   : > { %v672_v25 = vmul.f32 0.7978846, %v666_v23  ;;  %v665_v26 = vadd.f32 %v659_v24, %v635_v12 }
 0x1d7   : > { %1325 = vtanh.f32 %v672_v25  ;;  %v671_v27 = vmul.f32 0.7978846, %v665_v26 }
 0x1d9   : > { %1327 = vtanh.f32 %v671_v27 }
 0x1db   : > { %v1318_v28 = vpop.eup %1317 }
 0x1dc   : > { %v680_v29 = vadd.f32 1.0, %v1318_v28 }
 0x1dd   : > { %v1320_v30 = vpop.eup %1319 }
 0x1de   : > { %v679_v31 = vadd.f32 1.0, %v1320_v30  ;;  %v686_v32 = vmul.f32 0.5, %v680_v29 }
 0x1df   : > { %v1322_v33 = vpop.eup %1321 }
 0x1e0   : > { %v685_v34 = vmul.f32 0.5, %v679_v31  ;;  %v682_v35 = vadd.f32 1.0, %v1322_v33  ;;  %v692_v39 = vmul.f32 %v686_v32, %v620_v51  ;;  %v884_v51 = vld [vmem:[%s1622_s7 + $0x78] sm:$0xff] }
 0x1e1   : > { %v1324_v36 = vpop.eup %1323  ;;  %1256 = vmatprep.subr.mxu1 %v884_v51 }
 0x1e2   : > { %v691_v37 = vmul.f32 %v685_v34, %v615_v54  ;;  %v681_v38 = vadd.f32 1.0, %v1324_v36  ;;  %v688_v40 = vmul.f32 0.5, %v682_v35  ;;  %1257 = vmatpush3.msra.mxu1 %v884_v51  ;;  %v882_v54 = vld [vmem:[%s1622_s7 + $0x68] sm:$0xff] }
 0x1e3   : > { %1258 = vmatprep.subr.mxu1 %v883_v53 }
 0x1e4   : > { %v1326_v41 = vpop.eup %1325  ;;  %1247 = vmatprep.mubr.f32.mxu0 %v691_v37  ;;  %v687_v42 = vmul.f32 0.5, %v681_v38  ;;  %v694_v46 = vmul.f32 %v688_v40, %v630_v58  ;;  %1259 = vmatpush3.msra.mxu1 %v883_v53  ;;  %v878_v58 = vld [vmem:[%s1622_s7 + $0x48] sm:$0xff] }
 0x1e5   : > { %1248 = vmatmul.mubr.f32.vlgmr.msra.gmra.mxu0 %v692_v39  ;;  %v684_v43 = vadd.f32 1.0, %v1326_v41  ;;  %1260 = vmatprep.subr.mxu1 %v882_v54 }
 0x1e6   : > { %v1328_v44 = vpop.eup %1327  ;;  %v693_v45 = vmul.f32 %v687_v42, %v625_v63  ;;  %1261 = vmatpush3.msra.mxu1 %v882_v54  ;;  %v873_v63 = vld [vmem:[%s1622_s7 + $0x20] sm:$0xff] }
 0x1e7   : > { %v683_v47 = vadd.f32 1.0, %v1328_v44  ;;  %v690_v48 = vmul.f32 0.5, %v684_v43  ;;  %1262 = vmatprep.subr.mxu1 %v881_v55 }
 0x1e8   : > { %1250 = vmatprep.mubr.f32.mxu0 %v693_v45  ;;  %1263 = vmatpush3.msra.mxu1 %v881_v55 }
 0x1e9   : > { %1251 = vmatmul.mubr.f32.gmra.mxu0 %v694_v46  ;;  %v689_v49 = vmul.f32 0.5, %v683_v47  ;;  %v696_v52 = vmul.f32 %v690_v48, %v640_v5  ;;  %1264 = vmatprep.subr.mxu1 %v880_v56 }
 0x1ea   : > { %1265 = vmatpush3.msra.mxu1 %v880_v56 }
 0x1eb   : > { %v695_v50 = vmul.f32 %v689_v49, %v635_v12  ;;  %1266 = vmatprep.subr.mxu1 %v879_v57 }
 0x1ec   : > { %1267 = vmatpush3.msra.mxu1 %v879_v57 }
 0x1ed   : > { %1253 = vmatprep.mubr.f32.mxu0 %v695_v50  ;;  %1268 = vmatprep.subr.mxu1 %v878_v58 }
 0x1ee   : > { %1254 = vmatmul.mubr.f32.gmra.mxu0 %v696_v52  ;;  %1269 = vmatpush3.msra.mxu1 %v878_v58 }
 0x1ef   : > { %1270 = vmatprep.subr.mxu1 %v877_v59 }
 0x1f0   : > { %1271 = vmatpush3.msra.mxu1 %v877_v59 }
 0x1f1   : > { %1272 = vmatprep.subr.mxu1 %v876_v60 }
 0x1f2   : > { %1273 = vmatpush3.msra.mxu1 %v876_v60 }
 0x1f3   : > { %1274 = vmatprep.subr.mxu1 %v875_v61 }
 0x1f4   : > { %1275 = vmatpush3.msra.mxu1 %v875_v61 }
 0x1f5   : > { %1276 = vmatprep.subr.mxu1 %v874_v62 }
 0x1f6   : > { %1277 = vmatpush3.msra.mxu1 %v874_v62 }
 0x1f7   : > { %1278 = vmatprep.subr.mxu1 %v873_v63 }
 0x1f8   : > { %1279 = vmatpush3.msra.mxu1 %v873_v63 }
 0x1f9   : > { %1280 = vmatprep.subr.mxu1 %v872_v0 }
 0x1fa   : > { %1281 = vmatpush3.msra.mxu1 %v872_v0 }
 0x1fb   : > { %1282 = vmatprep.subr.mxu1 %v871_v1 }
 0x1fc   : > { %1283 = vmatpush3.msra.mxu1 %v871_v1 }
 0x1fd   : > { %1284 = vmatprep.subr.mxu1 %v870_v2 }
 0x1fe   : > { %1285 = vmatpush3.msra.mxu1 %v870_v2 }
 0x1ff   : > { %1286 = vmatprep.subr.mxu1 %v869_v3 }
 0x200   : > { %1287 = vmatpush3.msra.mxu1 %v869_v3 }
 0x2a5   : > { %v1249_v5 = vpop.f32.mrf.mxu0 }
 0x2a6   : > { %v792_v6 = vadd.f32 %v1249_v5, %v1065_v4 }
 0x2a7   : > { %v786_v7 = vpop.f32.mrf.mxu0 }
 0x2a8   : > { %v816_v8 = vmul.f32 %v792_v6, %v792_v6  ;;  %v787_v9 = vadd.f32 %v1065_v4, %v786_v7 }
 0x2a9   : > { %v1252_v10 = vpop.f32.mrf.mxu0 }
 0x2aa   : > { %v822_v11 = vmul.f32 %v816_v8, %v792_v6  ;;  %v815_v12 = vmul.f32 %v787_v9, %v787_v9  ;;  %v802_v13 = vadd.f32 %v1252_v10, %v1065_v4 }
 0x2ab   : > { %v796_v14 = vpop.f32.mrf.mxu0 }
 0x2ac   : > { %v828_v15 = vmul.f32 0.044715, %v822_v11  ;;  %v821_v16 = vmul.f32 %v815_v12, %v787_v9  ;;  %v818_v17 = vmul.f32 %v802_v13, %v802_v13  ;;  %v797_v18 = vadd.f32 %v1065_v4, %v796_v14 }
 0x2ae   : > { %v834_v19 = vadd.f32 %v828_v15, %v792_v6  ;;  %v827_v20 = vmul.f32 0.044715, %v821_v16  ;;  %v824_v21 = vmul.f32 %v818_v17, %v802_v13  ;;  %v817_v22 = vmul.f32 %v797_v18, %v797_v18  ;;  %v1255_v23 = vpop.f32.mrf.mxu0 }
 0x2af   : > { %v812_v24 = vadd.f32 %v1255_v23, %v1065_v4 }
 0x2b0   : > { %v840_v25 = vmul.f32 0.7978846, %v834_v19  ;;  %v833_v26 = vadd.f32 %v827_v20, %v787_v9  ;;  %v830_v27 = vmul.f32 0.044715, %v824_v21  ;;  %v823_v28 = vmul.f32 %v817_v22, %v797_v18  ;;  %v806_v29 = vpop.f32.mrf.mxu0 }
 0x2b1   : > { %v820_v30 = vmul.f32 %v812_v24, %v812_v24  ;;  %v807_v31 = vadd.f32 %v1065_v4, %v806_v29 }
 0x2b2   : > { %1329 = vtanh.f32 %v840_v25  ;;  %v839_v33 = vmul.f32 0.7978846, %v833_v26  ;;  %v836_v32 = vadd.f32 %v830_v27, %v802_v13  ;;  %v829_v34 = vmul.f32 0.044715, %v823_v28 }
 0x2b3   : > { %v826_v35 = vmul.f32 %v820_v30, %v812_v24  ;;  %v819_v36 = vmul.f32 %v807_v31, %v807_v31 }
 0x2b4   : > { %1331 = vtanh.f32 %v839_v33  ;;  %v842_v37 = vmul.f32 0.7978846, %v836_v32  ;;  %v835_v38 = vadd.f32 %v829_v34, %v797_v18 }
 0x2b5   : > { %v832_v39 = vmul.f32 0.044715, %v826_v35  ;;  %v825_v40 = vmul.f32 %v819_v36, %v807_v31 }
 0x2b6   : > { %1333 = vtanh.f32 %v842_v37  ;;  %v841_v41 = vmul.f32 0.7978846, %v835_v38 }
 0x2b7   : > { %v838_v42 = vadd.f32 %v832_v39, %v812_v24  ;;  %v831_v43 = vmul.f32 0.044715, %v825_v40 }
 0x2b8   : > { %1335 = vtanh.f32 %v841_v41 }
 0x2b9   : > { %v844_v44 = vmul.f32 0.7978846, %v838_v42  ;;  %v837_v45 = vadd.f32 %v831_v43, %v807_v31 }
 0x2bb   : > { %1337 = vtanh.f32 %v844_v44  ;;  %v843_v46 = vmul.f32 0.7978846, %v837_v45 }
 0x2bd   : > { %1339 = vtanh.f32 %v843_v46 }
 0x2bf   : > { %v1330_v47 = vpop.eup %1329 }
 0x2c0   : > { %v852_v48 = vadd.f32 1.0, %v1330_v47 }
 0x2c1   : > { %v1332_v49 = vpop.eup %1331 }
 0x2c2   : > { %v851_v50 = vadd.f32 1.0, %v1332_v49  ;;  %v858_v51 = vmul.f32 0.5, %v852_v48 }
 0x2c3   : > { %v1334_v52 = vpop.eup %1333 }
 0x2c4   : > { %v857_v53 = vmul.f32 0.5, %v851_v50  ;;  %v854_v54 = vadd.f32 1.0, %v1334_v52  ;;  %v864_v58 = vmul.f32 %v858_v51, %v792_v6  ;;  %v1066_v6 = vld [vmem:[%s1623_s8] ss:$0 sm:$0xff] }
 0x2c5   : > { %v1336_v55 = vpop.eup %1335 }
 0x2c6   : > { %v863_v56 = vmul.f32 %v857_v53, %v787_v9  ;;  %v853_v57 = vadd.f32 1.0, %v1336_v55  ;;  %v860_v59 = vmul.f32 0.5, %v854_v54 }
 0x2c8   : > { %v1338_v60 = vpop.eup %1337  ;;  %1288 = vmatprep.mubr.f32.mxu1 %v863_v56  ;;  %v859_v61 = vmul.f32 0.5, %v853_v57  ;;  %v866_v1 = vmul.f32 %v860_v59, %v802_v13 }
 0x2c9   : > { %1289 = vmatmul.mubr.f32.vlgmr.msra.gmra.mxu1 %v864_v58  ;;  %v856_v62 = vadd.f32 1.0, %v1338_v60 }
 0x2ca   : > { %v1340_v63 = vpop.eup %1339  ;;  %v865_v0 = vmul.f32 %v859_v61, %v797_v18 }
 0x2cb   : > { %v855_v2 = vadd.f32 1.0, %v1340_v63  ;;  %v862_v3 = vmul.f32 0.5, %v856_v62 }
 0x2cc   : > { %1291 = vmatprep.mubr.f32.mxu1 %v865_v0 }
 0x2cd   : > { %1292 = vmatmul.mubr.f32.gmra.mxu1 %v866_v1  ;;  %v861_v4 = vmul.f32 0.5, %v855_v2  ;;  %v868_v7 = vmul.f32 %v862_v3, %v812_v24 }
 0x2cf   : > { %v867_v5 = vmul.f32 %v861_v4, %v807_v31 }
 0x2d1   : > { %1294 = vmatprep.mubr.f32.mxu1 %v867_v5 }
 0x2d2   : > { %1295 = vmatmul.mubr.f32.gmra.mxu1 %v868_v7 }
 0x389   : > { %v1290_v8 = vpop.f32.mrf.mxu1 }
 0x38a   : > { %v964_v9 = vadd.f32 %v1290_v8, %v1066_v6 }
 0x38b   : > { %v958_v10 = vpop.f32.mrf.mxu1 }
 0x38c   : > { %989 = vst.msk [vmem:[%s334_s10 + $0x8] sm:$0xff] %vm987_vm1, %v964_v9  ;;  %v959_v11 = vadd.f32 %v1066_v6, %v958_v10 }
 0x38d   : > { %v1293_v12 = vpop.f32.mrf.mxu1 }
 0x38e   : > { %988 = vst.msk [vmem:[%s334_s10] sm:$0xff] %vm987_vm1, %v959_v11  ;;  %v974_v13 = vadd.f32 %v1293_v12, %v1066_v6 }
 0x38f   : > { %v968_v14 = vpop.f32.mrf.mxu1 }
 0x390   : > { %991 = vst.msk [vmem:[%s334_s10 + $0x18] sm:$0xff] %vm987_vm1, %v974_v13  ;;  %v969_v15 = vadd.f32 %v1066_v6, %v968_v14 }
 0x392   : > { %990 = vst.msk [vmem:[%s334_s10 + $0x10] sm:$0xff] %vm987_vm1, %v969_v15  ;;  %v1296_v16 = vpop.f32.mrf.mxu1 }
 0x393   : > { %v984_v17 = vadd.f32 %v1296_v16, %v1066_v6 }
 0x394   : > { %v978_v18 = vpop.f32.mrf.mxu1 }
 0x395   : > { %993 = vst.msk [vmem:[%s334_s10 + $0x28] sm:$0xff] %vm987_vm1, %v984_v17  ;;  %v979_v19 = vadd.f32 %v1066_v6, %v978_v18 }
 0x397   : > { %992 = vst.msk [vmem:[%s334_s10 + $0x20] sm:$0xff] %vm987_vm1, %v979_v19 }
 0x398 PF: > { %s19_s30 = sadd.s32 1, %s1347_s30  }
 0x399   : > { %p16_p4 = scmp.ge.s32.totalorder %s19_s30, 6  }
 0x39b   :  { %18 = sbr.rel (!%p16_p4) target bundleno = 1 (0x1), region = 86 }

</bundles_post_ra>
